<compile_context>
chip_gen: v7x
topology: tpu7x:2x2x1
jax: 0.10.0
libtpu: 0.0.40
codegen_flags: <defaults>
</compile_context>

<pallas_src>
import math

import jax
import jax.numpy as jnp
from jax.experimental import pallas as pl
from jax.experimental.pallas import tpu as pltpu

_LANE = 128


def _cdiv(a, b):
    return -(-a // b)


# ----------------------------------------------------------------------------
# Kernel
# ----------------------------------------------------------------------------
def make_mlp_q_kernel(num_hidden):
    """Kernel for `num_hidden` Linear+ReLU layers followed by Linear(h_last, 1).

    All activations are transposed, (features, tile_b): batch on the lane axis.

    Ref layout:
      (sa_ref,                                   # (n_in, tile_b)   bf16
       [w_i (out,in) bf16, b_i (out,1) f32] * num_hidden,
       w_last (1, h_last) bf16, b_last (1, 1) f32,
       out_ref)                                  # (1, tile_b) f32  lane-dense
    """
    assert num_hidden >= 1

    def kernel(sa_ref, *refs):
        out_ref = refs[-1]
        p = refs[:-1]

        x = sa_ref[...]                               # (n_in, tile_b) bf16
        idx = 0
        for _ in range(num_hidden):                   # statically unrolled
            w, b = p[idx], p[idx + 1]
            idx += 2
            x = jnp.dot(w[...], x, preferred_element_type=jnp.float32) + b[...]
            # bf16 ReLU: cast once, then max (bit-identical to max-then-cast);
            # halves the live activation between layers.
            x = jnp.maximum(x.astype(jnp.bfloat16), 0)

        # Output layer: (1, h_last) @ (h_last, tile_b) -> (1, tile_b) on the
        # (otherwise idle) MXU; the store is lane-dense, no masked column writes.
        w_last, b_last = p[idx], p[idx + 1]
        q = jnp.dot(w_last[...], x, preferred_element_type=jnp.float32)
        out_ref[...] = q + b_last[...]

    return kernel


# ----------------------------------------------------------------------------
# Parameters
# ----------------------------------------------------------------------------
def init_mlp_q_params(key, n_obs, n_act, hidden):
    """List of (w (in, out), b (out,)) in f32, matching nn.Linear default init."""
    sizes = []
    n_input = n_obs + n_act
    for n_output in hidden[:-1]:
        sizes.append((n_input, n_output))
        n_input = n_output
    sizes.append((n_input, 1))  # final Linear -> scalar Q

    params = []
    for fan_in, fan_out in sizes:
        key, kw, kb = jax.random.split(key, 3)
        bound = 1.0 / math.sqrt(fan_in)
        w = jax.random.uniform(
            kw, (fan_in, fan_out), minval=-bound, maxval=bound, dtype=jnp.float32
        )
        b = jax.random.uniform(
            kb, (fan_out,), minval=-bound, maxval=bound, dtype=jnp.float32
        )
        params.append((w, b))
    return params


def pack_params(params, compute_dtype=jnp.bfloat16):
    """Transpose weights to (out, in) for the batch-on-lanes kernel, cast
    matmul weights to bf16, keep biases in f32 as (out, 1) columns."""
    flat = []
    for w, b in params[:-1]:
        flat += [
            jnp.asarray(w).T.astype(compute_dtype),            # (out, in)
            jnp.asarray(b).reshape(-1, 1).astype(jnp.float32),  # (out, 1)
        ]
    w_last, b_last = params[-1]                                 # (h_last, 1), (1,)
    flat += [
        jnp.asarray(w_last).T.astype(compute_dtype),            # (1, h_last)
        jnp.asarray(b_last).reshape(1, 1).astype(jnp.float32),  # (1, 1)
    ]
    return flat


# ----------------------------------------------------------------------------
# Tiling
# ----------------------------------------------------------------------------
def _choose_batch_tiling(B, tile_b_max):
    """Pick (tile_b, b_pad, num_tiles): tile_b a multiple of 128, padding slack
    of at most one 128-lane unit per tile, and >= 2 grid steps whenever
    B >= 256 so the "parallel" batch axis can shard across v7x's 2 TCs."""
    tile_b_max = max(_LANE, (tile_b_max // _LANE) * _LANE)
    n_units = _cdiv(B, _LANE)
    tile_units_max = tile_b_max // _LANE
    num_tiles = max(_cdiv(n_units, tile_units_max), 2 if n_units >= 2 else 1)
    tile_units = _cdiv(n_units, num_tiles)
    num_tiles = _cdiv(n_units, tile_units)        # drop fully-empty tiles
    tile_b = tile_units * _LANE
    return tile_b, num_tiles * tile_b, num_tiles


# ----------------------------------------------------------------------------
# Forward wrapper
# ----------------------------------------------------------------------------
def mlp_q_forward(obs, act, params, *, tile_b_max=1024):
    """Pallas forward: returns q of shape (B,) in float32."""
    B, n_obs = obs.shape
    B2, n_act = act.shape
    assert B == B2
    n_in = n_obs + n_act
    num_hidden = len(params) - 1
    assert num_hidden >= 1, "need at least one hidden layer (len(hidden) >= 2)"

    tile_b, b_pad, num_tiles = _choose_batch_tiling(B, tile_b_max)

    # One host-side pass: concat obs|act (PyTorch's torch.concat), cast to bf16
    # (halves streamed HBM bytes), transpose to (features, batch) so batch
    # lives on the lane axis, pad batch up to num_tiles * tile_b.
    sa_t = jnp.concatenate([obs, act], axis=-1).astype(jnp.bfloat16).T
    if b_pad != B:
        sa_t = jnp.pad(sa_t, ((0, 0), (0, b_pad - B)))
    # TODO(synk): padded batch columns carry garbage Q values until sliced off
    # below; mask them if a fused consumer ever reads the full (1, b_pad) row.

    flat = pack_params(params)
    kernel = make_mlp_q_kernel(num_hidden)

    in_specs = [pl.BlockSpec((n_in, tile_b), lambda i: (0, i))]
    # Constant index_map -> parameters are DMA'd once and stay VMEM-resident.
    in_specs += [pl.BlockSpec(p.shape, lambda i: (0, 0)) for p in flat]
    out_spec = pl.BlockSpec((1, tile_b), lambda i: (0, i))

    # Advisory cost estimate so XLA can schedule surrounding ops around us.
    dims = [(w.shape[0], w.shape[1]) for w, _ in params]       # (in, out)
    flops = 2 * b_pad * sum(i * o for i, o in dims)
    param_bytes = sum(int(p.size) * p.dtype.itemsize for p in flat)
    bytes_accessed = b_pad * n_in * 2 + b_pad * 4 + param_bytes
    cost = pl.CostEstimate(
        flops=int(flops), transcendentals=0, bytes_accessed=int(bytes_accessed)
    )

    q = pl.pallas_call(
        kernel,
        out_shape=jax.ShapeDtypeStruct((1, b_pad), jnp.float32),
        grid=(num_tiles,),
        in_specs=in_specs,
        out_specs=out_spec,
        compiler_params=pltpu.CompilerParams(
            dimension_semantics=("parallel",),
        ),
        cost_estimate=cost,
    )(sa_t, *flat)

    # torch.squeeze(q, -1); drop padded batch columns.
    return q[0, :B]


# ----------------------------------------------------------------------------
# References
# ----------------------------------------------------------------------------
def mlp_q_reference(obs, act, params):
    """Plain-JAX reference mirroring the kernel's dtype strategy exactly
    (bf16 operands, f32 MXU accumulation, bf16 ReLU, transposed layout)."""
    x = jnp.concatenate([obs, act], axis=-1).astype(jnp.bfloat16).T
    for w, b in params[:-1]:
        x = jnp.dot(
            w.T.astype(jnp.bfloat16), x, preferred_element_type=jnp.float32
        ) + b.reshape(-1, 1)
        x = jnp.maximum(x.astype(jnp.bfloat16), 0)
    w_last, b_last = params[-1]
    q = jnp.dot(
        w_last.T.astype(jnp.bfloat16), x, preferred_element_type=jnp.float32
    ) + b_last.reshape(1, 1)
    return q[0]


def mlp_q_reference_f32(obs, act, params):
    """Pure f32 reference of the original PyTorch semantics (loose check)."""
    x = jnp.concatenate([obs, act], axis=-1).astype(jnp.float32)
    for i, (w, b) in enumerate(params):
        x = x @ w + b.reshape(1, -1)
        if i < len(params) - 1:
            x = jnp.maximum(x, 0.0)
    return jnp.squeeze(x, axis=-1)


# ----------------------------------------------------------------------------
if __name__ == "__main__":
    # Small shapes consistent with the module's forward; B chosen to exercise
    # batch padding and a multi-step grid (2 tiles of 256 lanes).
    B, n_obs, n_act = 300, 12, 4
    # hidden[:-1] -> Linear(16,64)+ReLU, Linear(64,32)+ReLU, then Linear(32,1)
    hidden = (64, 32, 32)

    key = jax.random.PRNGKey(0)
    k_obs, k_act, k_params = jax.random.split(key, 3)

    obs = jax.random.normal(k_obs, (B, n_obs), dtype=jnp.float32)
    act = jax.random.normal(k_act, (B, n_act), dtype=jnp.float32)
    params = init_mlp_q_params(k_params, n_obs, n_act, hidden)

    q = mlp_q_forward(obs, act, params)
    q = jax.block_until_ready(q)
    assert q.shape == (B,), q.shape

    # Strict check against a reference using the same bf16/f32 dtype path.
    q_ref = mlp_q_reference(obs, act, params)
    assert jnp.allclose(q, q_ref, atol=2e-3, rtol=2e-3), (q, q_ref)

    # Loose sanity check against pure-f32 PyTorch-equivalent math.
    q_f32 = mlp_q_reference_f32(obs, act, params)
    assert jnp.allclose(q, q_f32, atol=1e-1, rtol=1e-1), (q, q_f32)

    print("KERNEL_OK")
</pallas_src>

<mosaic_0001>
module attributes {stable_mosaic.version = 11 : i64} {
  func.func @kernel(%arg0: i32, %arg1: memref<16x256xbf16, #tpu.memory_space<vmem>>, %arg2: memref<64x16xbf16, #tpu.memory_space<vmem>>, %arg3: memref<64x1xf32, #tpu.memory_space<vmem>>, %arg4: memref<32x64xbf16, #tpu.memory_space<vmem>>, %arg5: memref<32x1xf32, #tpu.memory_space<vmem>>, %arg6: memref<1x32xbf16, #tpu.memory_space<vmem>>, %arg7: memref<1x1xf32, #tpu.memory_space<vmem>>, %arg8: memref<1x256xf32, #tpu.memory_space<vmem>>) attributes {dimension_semantics = [#tpu.dimension_semantics<parallel>], iteration_bounds = array<i64: 2>, scalar_prefetch = 0 : i64, scratch_operands = 0 : i64, tpu.core_type = #tpu.core_type<tc>, window_params = [{transform_indices = @transform_0, window_bounds = array<i64: 16, 256>}, {pipeline_mode = #tpu.pipeline_mode<synchronous>, transform_indices = @transform_1, window_bounds = array<i64: 64, 16>}, {pipeline_mode = #tpu.pipeline_mode<synchronous>, transform_indices = @transform_2, window_bounds = array<i64: 64, 1>}, {pipeline_mode = #tpu.pipeline_mode<synchronous>, transform_indices = @transform_3, window_bounds = array<i64: 32, 64>}, {pipeline_mode = #tpu.pipeline_mode<synchronous>, transform_indices = @transform_4, window_bounds = array<i64: 32, 1>}, {pipeline_mode = #tpu.pipeline_mode<synchronous>, transform_indices = @transform_5, window_bounds = array<i64: 1, 32>}, {pipeline_mode = #tpu.pipeline_mode<synchronous>, transform_indices = @transform_6, window_bounds = array<i64: 1, 1>}, {transform_indices = @transform_7, window_bounds = array<i64: 1, 256>}]} {
    %c0 = arith.constant 0 : index
    %c0_0 = arith.constant 0 : index
    %0 = vector.load %arg1[%c0, %c0_0] : memref<16x256xbf16, #tpu.memory_space<vmem>>, vector<16x256xbf16>
    %c0_1 = arith.constant 0 : index
    %c0_2 = arith.constant 0 : index
    %1 = vector.load %arg2[%c0_1, %c0_2] : memref<64x16xbf16, #tpu.memory_space<vmem>>, vector<64x16xbf16>
    %cst = arith.constant dense<0.000000e+00> : vector<64x256xf32>
    %2 = tpu.matmul %1, %0, %cst {dimension_numbers = #tpu.dot_dimension_numbers<[1], [0], [0], [1], [0, 0, 1, 1], [], []>} : vector<64x16xbf16>, vector<16x256xbf16>, vector<64x256xf32> -> vector<64x256xf32>
    %c0_3 = arith.constant 0 : index
    %c0_4 = arith.constant 0 : index
    %3 = vector.load %arg3[%c0_3, %c0_4] : memref<64x1xf32, #tpu.memory_space<vmem>>, vector<64x1xf32>
    %4 = vector.broadcast %3 : vector<64x1xf32> to vector<64x256xf32>
    %5 = arith.addf %2, %4 : vector<64x256xf32>
    %6 = arith.truncf %5 : vector<64x256xf32> to vector<64x256xbf16>
    %cst_5 = arith.constant 0.000000e+00 : bf16
    %7 = vector.broadcast %cst_5 : bf16 to vector<64x256xbf16>
    %8 = arith.maximumf %6, %7 : vector<64x256xbf16>
    %c0_6 = arith.constant 0 : index
    %c0_7 = arith.constant 0 : index
    %9 = vector.load %arg4[%c0_6, %c0_7] : memref<32x64xbf16, #tpu.memory_space<vmem>>, vector<32x64xbf16>
    %cst_8 = arith.constant dense<0.000000e+00> : vector<32x256xf32>
    %10 = tpu.matmul %9, %8, %cst_8 {dimension_numbers = #tpu.dot_dimension_numbers<[1], [0], [0], [1], [0, 0, 1, 1], [], []>} : vector<32x64xbf16>, vector<64x256xbf16>, vector<32x256xf32> -> vector<32x256xf32>
    %c0_9 = arith.constant 0 : index
    %c0_10 = arith.constant 0 : index
    %11 = vector.load %arg5[%c0_9, %c0_10] : memref<32x1xf32, #tpu.memory_space<vmem>>, vector<32x1xf32>
    %12 = vector.broadcast %11 : vector<32x1xf32> to vector<32x256xf32>
    %13 = arith.addf %10, %12 : vector<32x256xf32>
    %14 = arith.truncf %13 : vector<32x256xf32> to vector<32x256xbf16>
    %cst_11 = arith.constant 0.000000e+00 : bf16
    %15 = vector.broadcast %cst_11 : bf16 to vector<32x256xbf16>
    %16 = arith.maximumf %14, %15 : vector<32x256xbf16>
    %c0_12 = arith.constant 0 : index
    %c0_13 = arith.constant 0 : index
    %17 = vector.load %arg6[%c0_12, %c0_13] : memref<1x32xbf16, #tpu.memory_space<vmem>>, vector<1x32xbf16>
    %cst_14 = arith.constant dense<0.000000e+00> : vector<1x256xf32>
    %18 = tpu.matmul %17, %16, %cst_14 {dimension_numbers = #tpu.dot_dimension_numbers<[1], [0], [0], [1], [0, 0, 1, 1], [], []>} : vector<1x32xbf16>, vector<32x256xbf16>, vector<1x256xf32> -> vector<1x256xf32>
    %c0_15 = arith.constant 0 : index
    %c0_16 = arith.constant 0 : index
    %19 = vector.load %arg7[%c0_15, %c0_16] : memref<1x1xf32, #tpu.memory_space<vmem>>, vector<1x1xf32>
    %20 = vector.broadcast %19 : vector<1x1xf32> to vector<1x256xf32>
    %21 = arith.addf %18, %20 : vector<1x256xf32>
    %c0_17 = arith.constant 0 : index
    %c0_18 = arith.constant 0 : index
    %22 = vector.load %arg8[%c0_17, %c0_18] : memref<1x256xf32, #tpu.memory_space<vmem>>, vector<1x256xf32>
    tpu.vector_store %arg8[%c0_17, %c0_18], %21 {strides = array<i32>} : memref<1x256xf32, #tpu.memory_space<vmem>>, vector<1x256xf32>,
    return
  }
  func.func @transform_0(%arg0: i32) -> (i32, i32) {
    %c0_i32 = arith.constant 0 : i32
    %c0_i32_0 = arith.constant 0 : i32
    return %c0_i32, %arg0 : i32, i32
  }
  func.func @transform_1(%arg0: i32) -> (i32, i32) {
    %c0_i32 = arith.constant 0 : i32
    %c0_i32_0 = arith.constant 0 : i32
    %c0_i32_1 = arith.constant 0 : i32
    return %c0_i32, %c0_i32_0 : i32, i32
  }
  func.func @transform_2(%arg0: i32) -> (i32, i32) {
    %c0_i32 = arith.constant 0 : i32
    %c0_i32_0 = arith.constant 0 : i32
    %c0_i32_1 = arith.constant 0 : i32
    return %c0_i32, %c0_i32_0 : i32, i32
  }
  func.func @transform_3(%arg0: i32) -> (i32, i32) {
    %c0_i32 = arith.constant 0 : i32
    %c0_i32_0 = arith.constant 0 : i32
    %c0_i32_1 = arith.constant 0 : i32
    return %c0_i32, %c0_i32_0 : i32, i32
  }
  func.func @transform_4(%arg0: i32) -> (i32, i32) {
    %c0_i32 = arith.constant 0 : i32
    %c0_i32_0 = arith.constant 0 : i32
    %c0_i32_1 = arith.constant 0 : i32
    return %c0_i32, %c0_i32_0 : i32, i32
  }
  func.func @transform_5(%arg0: i32) -> (i32, i32) {
    %c0_i32 = arith.constant 0 : i32
    %c0_i32_0 = arith.constant 0 : i32
    %c0_i32_1 = arith.constant 0 : i32
    return %c0_i32, %c0_i32_0 : i32, i32
  }
  func.func @transform_6(%arg0: i32) -> (i32, i32) {
    %c0_i32 = arith.constant 0 : i32
    %c0_i32_0 = arith.constant 0 : i32
    %c0_i32_1 = arith.constant 0 : i32
    return %c0_i32, %c0_i32_0 : i32, i32
  }
  func.func @transform_7(%arg0: i32) -> (i32, i32) {
    %c0_i32 = arith.constant 0 : i32
    %c0_i32_0 = arith.constant 0 : i32
    return %c0_i32, %arg0 : i32, i32
  }
}

</mosaic_0001>

<bundles_post_ra>
// kernel: tpu_custom_call.1
= control target key start
LH: loop header
LB: loop body
LE: loop exit
PB: predicated region body
PF: predicated region fallthrough
CT: control target
= control target key end

     0   :  { %s1161_s0 = inlined_call_operand.vmem [shape: bf16[16,512], index: 0, kind: input, shape index: {}]   ;;  %s1162_s1 = inlined_call_operand.vmem [shape: bf16[64,16], index: 1, kind: input, shape index: {}]   ;;  %s1163_s2 = inlined_call_operand.vmem [shape: f32[64,1], index: 2, kind: input, shape index: {}]   ;;  %s1164_s3 = inlined_call_operand.vmem [shape: bf16[32,64], index: 3, kind: input, shape index: {}]   ;;  %s1165_s4 = inlined_call_operand.vmem [shape: f32[32,1], index: 4, kind: input, shape index: {}]   ;;  %s1166_s5 = inlined_call_operand.vmem [shape: bf16[1,32], index: 5, kind: input, shape index: {}]   ;;  %s1167_s6 = inlined_call_operand.<no memory space> [shape: f32[1,1], index: 6, kind: input, shape index: {}]   ;;  %s1168_s7 = inlined_call_operand.hbm [shape: f32[1,512], index: 7, kind: output, shape index: {}]  }
   0x1   :  { %v12_v0 = vstv %s1167_s6 }
   0x2   :  { %13 = vst [vmem:[#allocation2] sm:$0x1] %v12_v0 }
   0x3   :  { %14 = vsyncpa [#allocation5], 0 }
   0x4   :  { %16 = vsyncpa [#allocation5 + $0x1], 0  ;;  %s969_s26 = smov 0   ;;  %s971_s27 = smov 0  }
   0x5   :  { %s973_s28 = smov 0   ;;  %s975_s29 = smov 0  }
   0x6 LB: > { %s775_s6 = sadd.s32 4294967295, %s921_s29   ;;  %s776_s30 = sadd.s32 4294967294, %s921_s29   ;;  %s921_s29 = sphi %s975_s29, %s1174_s29   ;;  %s917_s28 = sphi %s973_s28, %s1173_s28   ;;  %s913_s27 = sphi %s971_s27, %s1172_s27   ;;  %s909_s26 = sphi %s969_s26, %s1171_s26  }
   0x7   : > { %s992_s8 = sadd.s32 1, %s921_s29   ;;  %s29_s9 = sadd.s32 1, %s917_s28 }
   0x8   : > { %s26_s10 = ssub.s32 %s921_s29, %s992_s8  ;;  %p36_p0 = scmp.ne.s32.totalorder %s917_s28, %s913_s27 }
   0x9   : > { %p27_p1 = scmp.eq.s32.totalorder %s26_s10, 0  ;;  %p37_p2 = scmp.eq.s32.totalorder %s921_s29, 0 }
   0xa   : > { %p192_p3 = scmp.eq.s32.totalorder %s775_s6, 1  ;;  %p197_p4 = scmp.ne.s32.totalorder %s913_s27, %s909_s26 }
   0xb   : > { %s1005_s11 = scalar_select %p27_p1, %s917_s28, %s29_s9  }
   0xc   : > { %p38_p5 = por %p37_p2, %p36_p0  ;;  %p1007_p6 = por %p192_p3, %p36_p0 }
   0xd   : > { %p198_p7 = scmp.eq.s32.totalorder %s776_s30, 1  ;;  %p778_p9 = scmp.ge.s32.totalorder %s921_s29, 2 }
   0xf   : > { %p1011_p8 = por %p198_p7, %p197_p4  ;;  %232 = sbr.rel (%p778_p9) target bundleno = 29 (0x1d), region = 40 }
  0x16   : > { %235 = sbr.rel (!%p38_p5) target bundleno = 29 (0x1d), region = 44  ;;  %s237_s14 = sand.u32 (%p38_p5), 1, %s917_s28  }
  0x17   : > { %s805_s15 = sshll.u32 (%p38_p5), %s921_s29, 3  ;;  %s779_s16 = sshll.u32 (%p38_p5), %s237_s14, 4 }
  0x18   : > { %s242_s19 = scalar_lea.vmem (%p38_p5), %s1161_s0, %s805_s15  ;;  %s239_s20 = scalar_lea.vmem (%p38_p5), [#allocation3], %s779_s16 }
  0x19   : > { %v272_v1 = vld [vmem:[%s242_s19] sm:$0xff] (%p38_p5)  ;;  %v274_v2 = vld [vmem:[%s242_s19 + $0x10] sm:$0xff] (%p38_p5) }
  0x1a   : > { %273 = vst [vmem:[%s239_s20] sm:$0xff] (%p38_p5), %v272_v1  ;;  %275 = vst [vmem:[%s239_s20 + $0x8] sm:$0xff] (%p38_p5), %v274_v2 }
  0x1d PF: > { %p782_p10 = scmp.ge.s32.totalorder %s921_s29, 1  ;;  %p280_p11 = scmp.lt.s32.totalorder %s921_s29, 3 }
  0x1f   : > { %p281_p12 = pnand %p782_p10, %p280_p11 }
  0x20   : > { %s1026_s21 = sand.u32 (!%p281_p12), 1, %s913_s27   ;;  %v923_v3 = vmov (!%p281_p12), 0   ;;  %v853_v6 = vld [vmem:[%s1162_s1] sm:$0xff] (!%p281_p12)   ;;  %vm409_vm0 = vcmask (!%p281_p12), 130048   ;;  %v333_v8 = vld [vmem:[%s1163_s2 + $0x10] sm:$0xff] (!%p281_p12)  ;;  %v332_v9 = vld [vmem:[%s1163_s2 + $0x8] sm:$0xff] (!%p281_p12) }
  0x21   : > { %284 = sbr.rel (%p281_p12) target bundleno = 757 (0x2f5), region = 82  ;;  %s783_s22 = sshll.u32 (!%p281_p12), %s1026_s21, 4  ;;  %454 = vmatprep.mubr.bf16.mxu0 (!%p281_p12), %v923_v3  ;;  %848 = vset.pattern.permute.xlu0 (!%p281_p12), %v923_v3  ;;  %v331_v7 = vld [vmem:[%s1163_s2] sm:$0xff] (!%p281_p12)  ;;  %v334_v10 = vld [vmem:[%s1163_s2 + $0x18] sm:$0xff] (!%p281_p12)  ;;  %v336_v12 = vld [vmem:[%s1163_s2 + $0x28] sm:$0xff] (!%p281_p12)  ;;  %vm549_vm1 = vcmask (!%p281_p12), 523264  }
  0x22   : > { %849 = vset.pattern.permute.xlu1 (!%p281_p12), %v923_v3  ;;  %588 = vmatprep.mubr.bf16.mxu1 (!%p281_p12), %v923_v3  ;;  %s289_s23 = scalar_lea.vmem (!%p281_p12), [#allocation3], %s783_s22  ;;  %v335_v11 = vld [vmem:[%s1163_s2 + $0x20] sm:$0xff] (!%p281_p12)  ;;  %v854_v13 = vld [vmem:[%s1162_s1 + $0x8] sm:$0xff] (!%p281_p12)   ;;  %v337_v14 = vld [vmem:[%s1163_s2 + $0x30] sm:$0xff] (!%p281_p12)  ;;  %vm628_vm2 = vcmask (!%p281_p12), 261120   ;;  %s784_s19 = sshll.u32 (!%p281_p12), %s1026_s21, 1 }
  0x23   : > { %v850_v4 = vld [vmem:[%s289_s23 + $0x4] ss:$8 sps:$4 sm:$0xff] (!%p281_p12)   ;;  %v852_v5 = vld [vmem:[%s289_s23] ss:$8 sps:$4 sm:$0xff] (!%p281_p12)   ;;  %341 = vperm.xlu0 (!%p281_p12), %848, %v331_v7   ;;  %351 = vperm.xlu1 (!%p281_p12), %849, %v333_v8   ;;  %s806_s20 = sshll.u32 (!%p281_p12), %s775_s6, 5  ;;  %s317_s22 = scalar_lea.vmem (!%p281_p12), [#allocation4], %s784_s19 }
  0x24   : > { %422 = vmatprep.subr.bf16.mxu0 (!%p281_p12), %v850_v4  ;;  %v338_v15 = vld [vmem:[%s1163_s2 + $0x38] sm:$0xff] (!%p281_p12)  ;;  %v515_v16 = vld [vmem:[%s1165_s4] sm:$0xff] (!%p281_p12)  ;;  %v516_v17 = vld [vmem:[%s1165_s4 + $0x8] sm:$0xff] (!%p281_p12)  ;;  %s711_s23 = sshll.u32 (!%p281_p12), %s317_s22, 4  ;;  %s1117_s30 = scalar_lea.hbm (!%p281_p12), %s1168_s7, %s806_s20  ;;  %s1119_s23 = int_to_ptr.vmem [resolvable:$true] %s711_s23 }
  0x25   : > { %423 = vmatpush1.bf16.msra.mxu0 (!%p281_p12), %v852_v5  ;;  %v855_v18 = vld [vmem:[%s1162_s1 + $0x10] sm:$0xff] (!%p281_p12)   ;;  %v518_v20 = vld [vmem:[%s1165_s4 + $0x18] sm:$0xff] (!%p281_p12)  ;;  %v618_v21 = vld [vmem:[#allocation2] sm:$0x1] (!%p281_p12)  ;;  %s697_s9 = scalar_lea.sflag (!%p281_p12), [#allocation5], %s1026_s21  ;;  %s859_s10 = scalar_lea.vmem (!%p281_p12), %s1119_s23, 32 }
  0x26   : > { %v517_v19 = vld [vmem:[%s1165_s4 + $0x10] sm:$0xff] (!%p281_p12)  ;;  %v856_v22 = vld [vmem:[%s1162_s1 + $0x18] sm:$0xff] (!%p281_p12)   ;;  %p860_p13 = scmp.ne.s32.totalorder (!%p281_p12), %s1119_s23, %s859_s10  ;;  %s925_s6 = smov (!%p281_p12), [#allocation4]  }
  0x27   : > { %346 = vperm.xlu0 (!%p281_p12), %848, %v332_v9   ;;  %356 = vperm.xlu1 (!%p281_p12), %849, %v334_v10   ;;  %s863_s14 = sshll.u32 (!%p281_p12), %s925_s6, 4  ;;  %s864_s14 = int_to_ptr.vmem [resolvable:$false] %s863_s14 }
  0x28   : > { %791 = vmatmul.mubr.msk.bf16.vlgmr.msra.gmra.mrb[0].mxu0 %vm409_vm0, %v853_v6  ;;  %p861_p0 = pnand %p860_p13, %p1007_p6  ;;  %s865_s15 = scalar_lea.vmem %s864_s14, 64 }
  0x29   : > { %464 = vmatprep.mubr.bf16.mxu0 %v923_v3  ;;  %p866_p2 = scmp.lt.s32.totalorder %s1119_s23, %s864_s14  ;;  %p867_p3 = scmp.lt.s32.totalorder %s865_s15, %s859_s10 }
  0x2a   : > { %p862_p1 = pneg %p861_p0 }
  0x2b   : > { %361 = vperm.xlu0 %848, %v335_v11   ;;  %366 = vperm.xlu1 %849, %v336_v12   ;;  %p868_p4 = por %p867_p3, %p866_p2 }
  0x2d   : > { %p869_p5 = pnand %p868_p4, %p862_p1 }
  0x2f   : > { %371 = vperm.xlu0 %848, %v337_v14   ;;  %376 = vperm.xlu1 %849, %v338_v15  }
  0x30   : > { %792 = vmatmul.mubr.msk.bf16.gmra.mrb[4].mxu0 %vm409_vm0, %v854_v13 }
  0x31   : > { %474 = vmatprep.mubr.bf16.mxu0 %v923_v3 }
  0x33   : > { %521 = vperm.xlu0 %848, %v515_v16   ;;  %526 = vperm.xlu1 %849, %v516_v17   ;;  %v857_v16 = vld [vmem:[%s1164_s3] sm:$0xff]   ;;  %v858_v17 = vld [vmem:[%s1164_s3 + $0x8] sm:$0xff]  }
  0x37   : > { %531 = vperm.xlu0 %848, %v517_v19   ;;  %536 = vperm.xlu1 %849, %v518_v20  }
  0x38   : > { %793 = vmatmul.mubr.msk.bf16.gmra.mrb[8].mxu0 %vm409_vm0, %v855_v18 }
  0x39   : > { %484 = vmatprep.mubr.bf16.mxu0 %v923_v3 }
  0x3b   : > { %621 = vperm.xlu0 %848, %v618_v21  }
  0x40   : > { %794 = vmatmul.mubr.msk.bf16.gmra.mrb[12].mxu0 %vm409_vm0, %v856_v22 }
  0xa2   : > { %v342_v23 = vpop.permute.xlu0 %341  ;;  %v352_v31 = vpop.permute.xlu1 %351 }
  0xa6   : > { %v347_v26 = vpop.permute.xlu0 %346  ;;  %v357_v40 = vpop.permute.xlu1 %356 }
  0xaa   : > { %v362_v51 = vpop.permute.xlu0 %361  ;;  %v367_v54 = vpop.permute.xlu1 %366 }
  0xae   : > { %v372_v1 = vpop.permute.xlu0 %371  ;;  %v377_v5 = vpop.permute.xlu1 %376 }
  0xb2   : > { %v522_v19 = vpop.permute.xlu0 %521  ;;  %v527_v21 = vpop.permute.xlu1 %526 }
  0xfb   : > { %v456_v24 = vpop.f32.mrb[0].mxu0 }
  0xfc   : > { %v458_v25 = vpop.f32.mrb[1].mxu0  ;;  %v457_v28 = vadd.f32 %v456_v24, %v342_v23 }
  0xfd   : > { %v460_v27 = vpop.f32.mrb[2].mxu0  ;;  %v459_v32 = vadd.f32 %v458_v25, %v342_v23 }
  0xfe   : > { %v461_v29 = vadd.f32 %v460_v27, %v347_v26  ;;  %v462_v30 = vpop.f32.mrb[3].mxu0 }
  0xff   : > { %v463_v33 = vadd.f32 %v462_v30, %v347_v26 }
 0x100   : > { %v495_v34 = vpack.c.bf16 %v461_v29, %v457_v28 }
 0x101   : > { %v496_v35 = vpack.c.bf16 %v463_v33, %v459_v32  ;;  %v532_v32 = vpop.permute.xlu0 %531 }
 0x102   : > { %v503_v39 = vmax.bf16 %v923_v3, %v495_v34 }
 0x103   : > { %v466_v36 = vpop.f32.mrb[4].mxu0  ;;  %v504_v37 = vmax.bf16 %v923_v3, %v496_v35  ;;  %v537_v35 = vpop.permute.xlu1 %536 }
 0x104   : > { %v468_v38 = vpop.f32.mrb[5].mxu0  ;;  %v467_v42 = vadd.f32 %v466_v36, %v352_v31 }
 0x105   : > { %v470_v41 = vpop.f32.mrb[6].mxu0  ;;  %556 = vmatprep.subr.bf16.mxu1 %v504_v37  ;;  %v469_v45 = vadd.f32 %v468_v38, %v352_v31 }
 0x106   : > { %v471_v43 = vadd.f32 %v470_v41, %v357_v40  ;;  %v472_v44 = vpop.f32.mrb[7].mxu0  ;;  %557 = vmatpush1.bf16.msra.mxu1 %v503_v39 }
 0x107   : > { %v473_v46 = vadd.f32 %v472_v44, %v357_v40 }
 0x108   : > { %v497_v47 = vpack.c.bf16 %v471_v43, %v467_v42 }
 0x109   : > { %v498_v48 = vpack.c.bf16 %v473_v46, %v469_v45  ;;  %v617_v46 = vld [vmem:[%s1166_s5] sm:$0x1] }
 0x10a   : > { %v505_v53 = vmax.bf16 %v923_v3, %v497_v47  ;;  %v624_v47 = vlaneseq }
 0x10b   : > { %v476_v49 = vpop.f32.mrb[8].mxu0  ;;  %v506_v50 = vmax.bf16 %v923_v3, %v498_v48 }
 0x10c   : > { %v478_v52 = vpop.f32.mrb[9].mxu0  ;;  %v477_v56 = vadd.f32 %v476_v49, %v362_v51  ;;  %v625_v48 = vshrl.u32 %v624_v47, 7  ;;  %v924_v49 = vmov 1966171168   ;;  %vm693_vm3 = vcmp.lt.s32.totalorder %v624_v47, 256 }
 0x10d   : > { %v480_v55 = vpop.f32.mrb[10].mxu0  ;;  %558 = vmatprep.subr.bf16.mxu1 %v506_v50  ;;  %v479_v59 = vadd.f32 %v478_v52, %v362_v51  ;;  %v677_v50 = vunpack.c.l.s4 %v924_v49  ;;  %v622_v52 = vpop.permute.xlu0 %621 }
 0x10e   : > { %v481_v57 = vadd.f32 %v480_v55, %v367_v54  ;;  %v482_v58 = vpop.f32.mrb[11].mxu0  ;;  %559 = vmatpush1.bf16.msra.mxu1 %v505_v53  ;;  %v626_v51 = vsub.s32 0, %v625_v48 }
 0x10f   : > { %v483_v60 = vadd.f32 %v482_v58, %v367_v54  ;;  %v678_v53 = vunpack.c.0.s8 %v677_v50 }
 0x110   : > { %v499_v61 = vpack.c.bf16 %v481_v57, %v477_v56  ;;  %v627_v54 = vrot.slane %v622_v52, %v626_v51 }
 0x111   : > { %v500_v62 = vpack.c.bf16 %v483_v60, %v479_v59  ;;  %v681_v58 = vsub.s32 %v678_v53, %v625_v48 }
 0x112   : > { %v507_v4 = vmax.bf16 %v923_v3, %v499_v61 }
 0x113   : > { %v486_v63 = vpop.f32.mrb[12].mxu0  ;;  %v508_v0 = vmax.bf16 %v923_v3, %v500_v62 }
 0x114   : > { %v488_v2 = vpop.f32.mrb[13].mxu0  ;;  %v487_v7 = vadd.f32 %v486_v63, %v372_v1 }
 0x115   : > { %v490_v6 = vpop.f32.mrb[14].mxu0  ;;  %560 = vmatprep.subr.bf16.mxu1 %v508_v0  ;;  %v489_v10 = vadd.f32 %v488_v2, %v372_v1 }
 0x116   : > { %v491_v8 = vadd.f32 %v490_v6, %v377_v5  ;;  %v492_v9 = vpop.f32.mrb[15].mxu0  ;;  %561 = vmatpush1.bf16.msra.mxu1 %v507_v4 }
 0x117   : > { %v493_v11 = vadd.f32 %v492_v9, %v377_v5 }
 0x118   : > { %v501_v12 = vpack.c.bf16 %v491_v8, %v487_v7 }
 0x119   : > { %v502_v13 = vpack.c.bf16 %v493_v11, %v489_v10 }
 0x11a   : > { %v509_v15 = vmax.bf16 %v923_v3, %v501_v12 }
 0x11b   : > { %v510_v14 = vmax.bf16 %v923_v3, %v502_v13 }
 0x11d   : > { %562 = vmatprep.subr.bf16.mxu1 %v510_v14 }
 0x11e   : > { %563 = vmatpush1.bf16.msra.mxu1 %v509_v15 }
 0x121   : > { %797 = vmatmul.mubr.msk.bf16.vlgmr.msra.gmra.mrb[0].mxu1 %vm549_vm1, %v857_v16 }
 0x122   : > { %598 = vmatprep.mubr.bf16.mxu1 %v923_v3 }
 0x129   : > { %798 = vmatmul.mubr.msk.bf16.gmra.mrb[4].mxu1 %vm549_vm1, %v858_v17 }
 0x12a   : > { %664 = vmatprep.mubr.bf16.mxu1 %v923_v3 }
 0x1f4   : > { %v590_v18 = vpop.f32.mrb[0].mxu1 }
 0x1f5   : > { %v592_v20 = vpop.f32.mrb[1].mxu1  ;;  %v591_v23 = vadd.f32 %v590_v18, %v522_v19 }
 0x1f6   : > { %v594_v22 = vpop.f32.mrb[2].mxu1  ;;  %v593_v26 = vadd.f32 %v592_v20, %v522_v19 }
 0x1f7   : > { %v595_v24 = vadd.f32 %v594_v22, %v527_v21  ;;  %v596_v25 = vpop.f32.mrb[3].mxu1 }
 0x1f8   : > { %v597_v27 = vadd.f32 %v596_v25, %v527_v21 }
 0x1f9   : > { %v609_v28 = vpack.c.bf16 %v595_v24, %v591_v23 }
 0x1fa   : > { %v610_v29 = vpack.c.bf16 %v597_v27, %v593_v26 }
 0x1fb   : > { %v613_v33 = vmax.bf16 %v923_v3, %v609_v28 }
 0x1fc   : > { %v600_v30 = vpop.f32.mrb[4].mxu1  ;;  %v614_v31 = vmax.bf16 %v923_v3, %v610_v29 }
 0x1fd   : > { %v602_v34 = vpop.f32.mrb[5].mxu1  ;;  %v601_v37 = vadd.f32 %v600_v30, %v532_v32 }
 0x1fe   : > { %v604_v36 = vpop.f32.mrb[6].mxu1  ;;  %632 = vmatprep.subr.bf16.mxu1 %v614_v31  ;;  %v603_v40 = vadd.f32 %v602_v34, %v532_v32 }
 0x1ff   : > { %v605_v38 = vadd.f32 %v604_v36, %v537_v35  ;;  %v606_v39 = vpop.f32.mrb[7].mxu1  ;;  %633 = vmatpush1.bf16.msra.mxu1 %v613_v33 }
 0x200   : > { %v607_v41 = vadd.f32 %v606_v39, %v537_v35 }
 0x201   : > { %v611_v42 = vpack.c.bf16 %v605_v38, %v601_v37 }
 0x202   : > { %v612_v43 = vpack.c.bf16 %v607_v41, %v603_v40 }
 0x203   : > { %v615_v45 = vmax.bf16 %v923_v3, %v611_v42 }
 0x204   : > { %v616_v44 = vmax.bf16 %v923_v3, %v612_v43 }
 0x206   : > { %634 = vmatprep.subr.bf16.mxu1 %v616_v44 }
 0x207   : > { %635 = vmatpush1.bf16.msra.mxu1 %v615_v45 }
 0x20a   : > { %799 = vmatmul.mubr.msk.bf16.vlgmr.msra.gmra.mrb[8].mxu1 %vm628_vm2, %v617_v46 }
 0x2dd   : > { %v666_v55 = vpop.f32.mrb[8].mxu1 }
 0x2de   : > { %v667_v3 = vadd.f32 %v666_v55, %v627_v54  ;;  %v668_v56 = vpop.f32.mrb[9].mxu1 }
 0x2df   : > { %v669_v57 = vadd.f32 %v668_v56, %v627_v54  ;;  %v670_v59 = vpop.f32.mrb[10].mxu1 }
 0x2e0   : > { %v671_v60 = vpop.f32.mrb[11].mxu1 }
 0x2e1   : > { %v675_v61 = vcombine.low %v667_v3, %v669_v57 }
 0x2e3   : > { %v682_v62 = vrot.slane %v675_v61, %v681_v58 }
 0x2e5   : > { %v689_v63 = vrot.slane %v682_v62, %v681_v58 }
 0x2e7   : > { %695 = vst.msk [vmem:[%s317_s22] sm:$0x3] %vm693_vm3, %v689_v63 }
 0x2e8   : > { %872 = shalt.err (!%p869_p5)
}
 0x2e9   : > { %s873_s21 = scalar_lea.hbm %s1117_s30, 32  ;;  %s877_s18 = scalar_lea.hbm %s1168_s7, 64 }
 0x2ea   : > { %p874_p7 = scmp.ne.s32.totalorder %s1117_s30, %s873_s21  ;;  %p878_p12 = scmp.lt.u32.totalorder %s1117_s30, %s1168_s7 }
 0x2eb   : > { %p879_p13 = scmp.lt.u32.totalorder %s877_s18, %s873_s21  ;;  %p881_p1 = scmp.lt.u32.totalorder %s873_s21, %s1117_s30 }
 0x2ec   : > { %p875_p10 = pnand %p874_p7, %p1007_p6 }
 0x2ed   : > { %p880_p0 = por %p879_p13, %p878_p12 }
 0x2ee   : > { %p876_p11 = pneg %p875_p10 }
 0x2ef   : > { %p882_p2 = por %p881_p1, %p880_p0 }
 0x2f1   : > { %p883_p3 = pnand %p882_p2, %p876_p11 }
 0x2f3   : > { %886 = shalt.err (!%p883_p3)
}
 0x2f4   : > { %807 = dma.vmem_to_hbm [thread:$0]  (%p1007_p6), %s1119_s23, 32, %s1117_s30, %s697_s9  }
 0x2f5 PF: > { %s723_s22 = sand.u32 1, %s909_s26   ;;  %p810_p4 = pnand %p778_p9, %p1011_p8 }
 0x2f6   : > { %s724_s24 = scalar_lea.sflag [#allocation5], %s723_s22 }
 0x2f7   : > { %904 = dma.done.wait (!%p810_p4), %s724_s24, 32  }
 0x2f8   : > { %906 = vsyncadd (!%p810_p4), %s724_s24, 4294967264  ;;  %p19_p5 = scmp.ge.s32.totalorder %s992_s8, 4   ;;  %s1171_s26 = smov %s913_s27 }
 0x2f9   : > { %s1172_s27 = smov %s917_s28  ;;  %s1173_s28 = smov %s1005_s11 }
 0x2fa   : > { %s1174_s29 = smov %s992_s8  ;;  %21 = sbr.rel (!%p19_p5) target bundleno = 6 (0x6), region = 126 }
 0x301   :  { %729 = vsyncpa [#allocation5], 1 }
 0x302   :  { %731 = vsyncpa [#allocation5 + $0x1], 1 }

</bundles_post_ra>
